<compile_context>
chip_gen: v7x
topology: tpu7x:2x2x1
jax: 0.10.0
libtpu: 0.0.40
codegen_flags: <defaults>
</compile_context>

<pallas_src>
import jax
import jax.numpy as jnp
from jax.experimental import pallas as pl
from jax.experimental.pallas import tpu as pltpu


def _quat_loss_kernel(ind_ref, feat_ref, tgt_ref, out_ref):
    """Per-batch body.  Grid = (B,), each step writes its own (1, Kp) row.

    ind_ref  : (1, 1, Kp) i32  VMEM — gather indices into HW (clipped, padded)
    feat_ref : (1, C, HW) any  VMEM — per-batch feature slab (native dtype)
    tgt_ref  : (1, C, Kp) f32  VMEM — mask-applied target quats, channel-major
    out_ref  : (1, 1, Kp) f32       — per-slot cosine term w_k
    """
    feat = feat_ref[0]                     # (C, HW), native dtype
    tgt = tgt_ref[0]                       # (C, Kp), f32
    ind_row = ind_ref[0]                   # (1, Kp), i32

    C, HW = feat.shape
    Kp = tgt.shape[1]

    # --- in-VMEM one-hot gather on the MXU: pred[:, k] = feat[:, ind[k]] ----
    hw_iota = jax.lax.broadcasted_iota(jnp.int32, (HW, Kp), 0)
    onehot = (hw_iota == ind_row).astype(feat.dtype)           # (HW, Kp)
    pred = jnp.dot(feat, onehot,
                   preferred_element_type=jnp.float32)          # (C, Kp) f32

    # --- L2-normalize pred / target along the quaternion (channel) axis -----
    eps2 = jnp.float32(1e-24)              # eps = 1e-12 on the norm, squared
    npred = pred * jax.lax.rsqrt(
        jnp.maximum(jnp.sum(pred * pred, axis=0, keepdims=True), eps2))
    ntgt = tgt * jax.lax.rsqrt(
        jnp.maximum(jnp.sum(tgt * tgt, axis=0, keepdims=True), eps2))

    # The xyz sign flip on the target cancels exactly against the final
    # (-m0 - m1 - m2 + m3) combination, so w_k is the plain channel dot.
    # Masked / padded slots have an all-zero target column -> contribute 0.
    out_ref[0] = jnp.sum(npred * ntgt, axis=0, keepdims=True)   # (1, Kp)


def quat_loss(output_nchw, mask, ind, target):
    """output_nchw: (B,C,H,W), mask: (B,K), ind: (B,K) int, target: (B,K,C)."""
    B, C, H, W = output_nchw.shape
    K = ind.shape[1]
    HW = H * W
    Kp = pl.cdiv(K, 128) * 128             # lane-dense K (multiple of 128)

    # NCHW -> (B, C, HW) is a free reshape; the feature map stays in its
    # native dtype (no full-map astype / transpose round-trip through HBM).
    feat = output_nchw.reshape(B, C, HW)

    mask_f = mask.astype(jnp.float32)                              # (B, K)
    # Clamp indices so the one-hot gather matches PyTorch's in-range gather.
    ind_i32 = jnp.clip(ind.astype(jnp.int32), 0, HW - 1)          # (B, K)
    ind_pad = jnp.pad(ind_i32, ((0, 0), (0, Kp - K)))             # (B, Kp)
    ind_pad = ind_pad.reshape(B, 1, Kp)

    # Mask-applied, channel-major target.  Padded slots stay all-zero so they
    # contribute nothing to the per-batch sum.
    tgt = target.astype(jnp.float32) * mask_f[:, :, None]          # (B, K, C)
    tgt = jnp.transpose(tgt, (0, 2, 1))                            # (B, C, K)
    tgt = jnp.pad(tgt, ((0, 0), (0, 0), (0, Kp - K)))              # (B, C, Kp)

    w = pl.pallas_call(
        _quat_loss_kernel,
        out_shape=jax.ShapeDtypeStruct((B, 1, Kp), jnp.float32),
        grid=(B,),
        in_specs=[
            pl.BlockSpec((1, 1, Kp), lambda b: (b, 0, 0)),   # indices
            pl.BlockSpec((1, C, HW), lambda b: (b, 0, 0)),   # feature slab
            pl.BlockSpec((1, C, Kp), lambda b: (b, 0, 0)),   # masked target
        ],
        out_specs=pl.BlockSpec((1, 1, Kp), lambda b: (b, 0, 0)),
        compiler_params=pltpu.CompilerParams(
            dimension_semantics=("parallel",)),   # per-batch, megacore-friendly
        # NOTE: for large C*HW slabs on v5e/v7x, raise vmem_limit_bytes here.
    )(ind_pad, feat, tgt)

    # Tiny per-batch scalar math stays in the wrapper (free vs. kernel stores).
    w_sum = jnp.sum(w[:, 0, :], axis=1)           # padded slots contribute 0
    n_mask = jnp.sum(mask_f, axis=1)              # per-batch valid count
    return jnp.mean(w_sum / n_mask)


def quat_loss_ref(output_nchw, mask, ind, target):
    """Pure-JAX reference with the same (intended) semantics."""
    B, C, H, W = output_nchw.shape
    K = ind.shape[1]
    feat = jnp.transpose(output_nchw, (0, 2, 3, 1)).reshape(B, H * W, C)
    idx = jnp.broadcast_to(ind.astype(jnp.int32)[:, :, None], (B, K, C))
    pred = jnp.take_along_axis(feat, idx, axis=1)                 # (B, K, C)
    m = mask.astype(jnp.float32)[:, :, None]
    eps = 1e-12
    pm = pred * m
    tm = target * m
    npred = pm / jnp.maximum(jnp.linalg.norm(pm, axis=2, keepdims=True), eps)
    ntgt = tm / jnp.maximum(jnp.linalg.norm(tm, axis=2, keepdims=True), eps)
    sign = jnp.array([-1.0, -1.0, -1.0, 1.0], dtype=jnp.float32)
    mat = npred * (ntgt * sign)
    w = jnp.sum(mat * sign, axis=2)                               # (B, K)
    n_mask = jnp.sum(m[..., 0], axis=1)                           # (B,)
    return jnp.mean(jnp.sum(w, axis=1) / n_mask)


if __name__ == "__main__":
    B, C, H, W, K = 2, 4, 16, 16, 8
    key = jax.random.PRNGKey(0)
    k1, k2, k3 = jax.random.split(key, 3)

    output = jax.random.normal(k1, (B, C, H, W), dtype=jnp.float32)
    target = jax.random.normal(k2, (B, K, C), dtype=jnp.float32)
    ind = jax.random.randint(k3, (B, K), 0, H * W, dtype=jnp.int32)
    # valid for the first 5 slots of every batch element (>=1 valid per batch)
    mask = (jnp.arange(K)[None, :] < 5).astype(jnp.float32)
    mask = jnp.broadcast_to(mask, (B, K))

    loss = jax.block_until_ready(quat_loss(output, mask, ind, target))
    ref = jax.block_until_ready(quat_loss_ref(output, mask, ind, target))

    assert jnp.isfinite(loss), "loss is not finite"
    assert jnp.allclose(loss, ref, rtol=1e-5, atol=1e-5), (loss, ref)
    print("KERNEL_OK")
</pallas_src>

<mosaic_0001>
module attributes {stable_mosaic.version = 11 : i64} {
  func.func @_quat_loss_kernel(%arg0: i32, %arg1: memref<1x1x128xi32, #tpu.memory_space<vmem>>, %arg2: memref<1x4x256xf32, #tpu.memory_space<vmem>>, %arg3: memref<1x4x128xf32, #tpu.memory_space<vmem>>, %arg4: memref<1x1x128xf32, #tpu.memory_space<vmem>>) attributes {dimension_semantics = [#tpu.dimension_semantics<parallel>], iteration_bounds = array<i64: 2>, scalar_prefetch = 0 : i64, scratch_operands = 0 : i64, tpu.core_type = #tpu.core_type<tc>, window_params = [{transform_indices = @transform_0, window_bounds = array<i64: 1, 1, 128>}, {transform_indices = @transform_1, window_bounds = array<i64: 1, 4, 256>}, {transform_indices = @transform_2, window_bounds = array<i64: 1, 4, 128>}, {transform_indices = @transform_3, window_bounds = array<i64: 1, 1, 128>}]} {
    %c0 = arith.constant 0 : index
    %c0_0 = arith.constant 0 : index
    %c0_1 = arith.constant 0 : index
    %0 = vector.load %arg2[%c0, %c0_0, %c0_1] : memref<1x4x256xf32, #tpu.memory_space<vmem>>, vector<1x4x256xf32>
    %1 = vector.shape_cast %0 : vector<1x4x256xf32> to vector<4x256xf32>
    %c0_2 = arith.constant 0 : index
    %c0_3 = arith.constant 0 : index
    %c0_4 = arith.constant 0 : index
    %2 = vector.load %arg3[%c0_2, %c0_3, %c0_4] : memref<1x4x128xf32, #tpu.memory_space<vmem>>, vector<1x4x128xf32>
    %3 = vector.shape_cast %2 : vector<1x4x128xf32> to vector<4x128xf32>
    %c0_5 = arith.constant 0 : index
    %c0_6 = arith.constant 0 : index
    %c0_7 = arith.constant 0 : index
    %4 = vector.load %arg1[%c0_5, %c0_6, %c0_7] : memref<1x1x128xi32, #tpu.memory_space<vmem>>, vector<1x1x128xi32>
    %5 = vector.shape_cast %4 : vector<1x1x128xi32> to vector<1x128xi32>
    %6 = tpu.iota {dimensions = array<i32: 0>} : vector<256x128xi32>
    %7 = vector.broadcast %5 : vector<1x128xi32> to vector<256x128xi32>
    %8 = arith.cmpi eq, %6, %7 : vector<256x128xi32>
    %9 = arith.extui %8 : vector<256x128xi1> to vector<256x128xi32>
    %10 = arith.sitofp %9 : vector<256x128xi32> to vector<256x128xf32>
    %cst = arith.constant dense<0.000000e+00> : vector<4x128xf32>
    %11 = tpu.matmul %1, %10, %cst {dimension_numbers = #tpu.dot_dimension_numbers<[1], [0], [0], [1], [0, 0, 1, 1], [], []>} : vector<4x256xf32>, vector<256x128xf32>, vector<4x128xf32> -> vector<4x128xf32>
    %12 = arith.mulf %11, %11 : vector<4x128xf32>
    %cst_8 = arith.constant dense<0.000000e+00> : vector<128xf32>
    %13 = vector.multi_reduction <add>, %12, %cst_8 [0] : vector<4x128xf32> to vector<128xf32>
    %14 = vector.shape_cast %13 : vector<128xf32> to vector<1x128xf32>
    %cst_9 = arith.constant 1.000000e-24 : f32
    %15 = vector.broadcast %cst_9 : f32 to vector<1x128xf32>
    %16 = arith.maximumf %14, %15 : vector<1x128xf32>
    %17 = math.rsqrt %16 : vector<1x128xf32>
    %18 = vector.broadcast %17 : vector<1x128xf32> to vector<4x128xf32>
    %19 = arith.mulf %11, %18 : vector<4x128xf32>
    %20 = arith.mulf %3, %3 : vector<4x128xf32>
    %cst_10 = arith.constant dense<0.000000e+00> : vector<128xf32>
    %21 = vector.multi_reduction <add>, %20, %cst_10 [0] : vector<4x128xf32> to vector<128xf32>
    %22 = vector.shape_cast %21 : vector<128xf32> to vector<1x128xf32>
    %cst_11 = arith.constant 1.000000e-24 : f32
    %23 = vector.broadcast %cst_11 : f32 to vector<1x128xf32>
    %24 = arith.maximumf %22, %23 : vector<1x128xf32>
    %25 = math.rsqrt %24 : vector<1x128xf32>
    %26 = vector.broadcast %25 : vector<1x128xf32> to vector<4x128xf32>
    %27 = arith.mulf %3, %26 : vector<4x128xf32>
    %28 = arith.mulf %19, %27 : vector<4x128xf32>
    %cst_12 = arith.constant dense<0.000000e+00> : vector<128xf32>
    %29 = vector.multi_reduction <add>, %28, %cst_12 [0] : vector<4x128xf32> to vector<128xf32>
    %30 = vector.shape_cast %29 : vector<128xf32> to vector<1x128xf32>
    %c0_13 = arith.constant 0 : index
    %c0_14 = arith.constant 0 : index
    %c0_15 = arith.constant 0 : index
    %31 = vector.load %arg4[%c0_13, %c0_14, %c0_15] : memref<1x1x128xf32, #tpu.memory_space<vmem>>, vector<1x1x128xf32>
    %32 = vector.shape_cast %31 : vector<1x1x128xf32> to vector<1x128xf32>
    %33 = vector.shape_cast %30 : vector<1x128xf32> to vector<1x1x128xf32>
    tpu.vector_store %arg4[%c0_13, %c0_14, %c0_15], %33 {strides = array<i32>} : memref<1x1x128xf32, #tpu.memory_space<vmem>>, vector<1x1x128xf32>,
    return
  }
  func.func @transform_0(%arg0: i32) -> (i32, i32, i32) {
    %c0_i32 = arith.constant 0 : i32
    %c0_i32_0 = arith.constant 0 : i32
    %c0_i32_1 = arith.constant 0 : i32
    return %arg0, %c0_i32, %c0_i32_0 : i32, i32, i32
  }
  func.func @transform_1(%arg0: i32) -> (i32, i32, i32) {
    %c0_i32 = arith.constant 0 : i32
    %c0_i32_0 = arith.constant 0 : i32
    %c0_i32_1 = arith.constant 0 : i32
    return %arg0, %c0_i32, %c0_i32_0 : i32, i32, i32
  }
  func.func @transform_2(%arg0: i32) -> (i32, i32, i32) {
    %c0_i32 = arith.constant 0 : i32
    %c0_i32_0 = arith.constant 0 : i32
    %c0_i32_1 = arith.constant 0 : i32
    return %arg0, %c0_i32, %c0_i32_0 : i32, i32, i32
  }
  func.func @transform_3(%arg0: i32) -> (i32, i32, i32) {
    %c0_i32 = arith.constant 0 : i32
    %c0_i32_0 = arith.constant 0 : i32
    %c0_i32_1 = arith.constant 0 : i32
    return %arg0, %c0_i32, %c0_i32_0 : i32, i32, i32
  }
}

</mosaic_0001>

<bundles_post_ra>
// kernel: tpu_custom_call.1
= control target key start
LH: loop header
LB: loop body
LE: loop exit
PB: predicated region body
PF: predicated region fallthrough
CT: control target
= control target key end

     0   :  { %s1322_s0 = inlined_call_operand.hbm [shape: s32[2,1,128], index: 0, kind: input, shape index: {}]   ;;  %s1323_s1 = inlined_call_operand.hbm [shape: f32[2,4,256], index: 1, kind: input, shape index: {}]   ;;  %s1324_s2 = inlined_call_operand.hbm [shape: f32[2,4,128], index: 2, kind: input, shape index: {}]   ;;  %s1325_s3 = inlined_call_operand.hbm [shape: f32[2,1,128], index: 3, kind: output, shape index: {}]  }
   0x1   :  { %1330 = sst [smem:[#allocation13_spill]] %s1322_s0 }
   0x2   :  { %1331 = sst [smem:[#allocation14_spill]] %s1323_s1 }
   0x3   :  { %8 = vsyncpa [#allocation3], 0 }
   0x4   :  { %10 = vsyncpa [#allocation3 + $0x1], 0 }
   0x5   :  { %11 = vsyncpa [#allocation6], 0 }
   0x6   :  { %13 = vsyncpa [#allocation6 + $0x1], 0 }
   0x7   :  { %14 = vsyncpa [#allocation4], 0 }
   0x8   :  { %16 = vsyncpa [#allocation4 + $0x1], 0  ;;  %s1011_s12 = smov 0   ;;  %s1013_s13 = smov 0  }
   0x9   :  { %s1015_s14 = smov 0   ;;  %s1017_s15 = smov 0  }
   0xa LB: > { %s1032_s16 = sadd.s32 4294967295, %s984_s15   ;;  %s614_s17 = sadd.s32 4294967294, %s984_s15   ;;  %s984_s15 = sphi %s1017_s15, %s1354_s15   ;;  %s980_s14 = sphi %s1015_s14, %s1353_s14   ;;  %s976_s13 = sphi %s1013_s13, %s1352_s13   ;;  %s972_s12 = sphi %s1011_s12, %s1351_s12  }
   0xb   : > { %s1036_s18 = sadd.s32 1, %s984_s15   ;;  %s29_s19 = sadd.s32 1, %s980_s14 }
   0xc   : > { %s26_s20 = ssub.s32 %s984_s15, %s1036_s18  ;;  %p36_p0 = scmp.ne.s32.totalorder %s980_s14, %s976_s13 }
   0xd   : > { %p27_p1 = scmp.eq.s32.totalorder %s26_s20, 0  ;;  %p37_p2 = scmp.eq.s32.totalorder %s984_s15, 0 }
   0xe   : > { %p42_p3 = scmp.ne.s32.totalorder %s976_s13, %s972_s12  ;;  %p43_p4 = scmp.eq.s32.totalorder %s1032_s16, 0 }
   0xf   : > { %s1048_s21 = scalar_select %p27_p1, %s980_s14, %s29_s19  }
  0x10   : > { %p38_p5 = por %p37_p2, %p36_p0  ;;  %p1050_p6 = por %p43_p4, %p42_p3 }
  0x11   : > { %1332 = sst [smem:[#allocation12_spill]] %s1048_s21  ;;  %p118_p7 = scmp.eq.s32.totalorder %s1032_s16, 1 }
  0x12   : > { %s1333_s22 = scalar_select %p1050_p6, 1, 0 }
  0x13   : > { %p124_p8 = scmp.eq.s32.totalorder %s614_s17, 1  ;;  %p784_p10 = scmp.lt.s32.totalorder %s984_s15, 2 }
  0x14   : > { %p1057_p11 = por %p118_p7, %p36_p0  ;;  %s1066_s25 = sand.u32 1, %s980_s14  }
  0x15   : > { %p1061_p12 = por %p124_p8, %p42_p3  ;;  %p1068_p13 = pnand %p784_p10, %p38_p5 }
  0x16   : > { %s1334_s23 = scalar_select %p1057_p11, 1, 0 }
  0x17   : > { %s1335_s24 = scalar_select %p1061_p12, 1, 0 }
  0x18   : > { %s1336_s26 = scalar_select %p1068_p13, 1, 0 }
  0x19   : > { %s161_s27 = sand.u32 1, %s984_s15   ;;  %s618_s28 = sshll.u32 %s1066_s25, 3 }
  0x1a   : > { %s694_s29 = sshll.u32 %s984_s15, 7  ;;  %s1337_s1 = sld [smem:[#allocation14_spill]] }
  0x1b   : > { %s165_s6 = scalar_lea.vmem [#allocation5], %s618_s28  ;;  %s1083_s8 = scalar_lea.sflag [#allocation6], %s161_s27 }
  0x1c   : > { %s173_s7 = sshll.u32 %s165_s6, 4  ;;  %p1089_p2 = pneg %p1068_p13  ;;  %s1080_s7 = int_to_ptr.vmem [resolvable:$true] %s173_s7 }
  0x20   : > { %s1078_s5 = scalar_lea.hbm %s1337_s1, %s694_s29  ;;  %s829_s19 = scalar_lea.hbm %s1337_s1, 256 }
  0x21   : > { %s824_s9 = scalar_lea.hbm %s1078_s5, 128  ;;  %p830_p5 = scmp.lt.u32.totalorder %s1078_s5, %s1337_s1 }
  0x22   : > { %p825_p1 = scmp.ne.s32.totalorder %s1078_s5, %s824_s9  ;;  %p831_p7 = scmp.lt.u32.totalorder %s829_s19, %s824_s9 }
  0x23   : > { %p833_p10 = scmp.lt.u32.totalorder %s824_s9, %s1078_s5 }
  0x24   : > { %p827_p3 = pnand %p1089_p2, %p825_p1  ;;  %p832_p8 = por %p831_p7, %p830_p5 }
  0x26   : > { %p828_p4 = pneg %p827_p3  ;;  %p834_p9 = por %p833_p10, %p832_p8 }
  0x28   : > { %p835_p0 = pnand %p834_p9, %p828_p4 }
  0x2a   : > { %838 = shalt.err (!%p835_p0)
}
  0x2b   : > { %s839_s27 = scalar_lea.vmem %s1080_s7, 128  ;;  %s986_s29 = smov [#allocation5]  }
  0x2c   : > { %p840_p1 = scmp.ne.s32.totalorder %s1080_s7, %s839_s27  ;;  %s844_s30 = sshll.u32 %s986_s29, 4  ;;  %s845_s30 = int_to_ptr.vmem [resolvable:$false] %s844_s30 }
  0x2d   : > { %s846_s4 = scalar_lea.vmem %s845_s30, 256  ;;  %p847_p11 = scmp.lt.s32.totalorder %s1080_s7, %s845_s30 }
  0x2e   : > { %p842_p3 = pnand %p840_p1, %p1089_p2  ;;  %p848_p6 = scmp.lt.s32.totalorder %s846_s4, %s839_s27 }
  0x30   : > { %p843_p12 = pneg %p842_p3  ;;  %p849_p5 = por %p848_p6, %p847_p11 }
  0x32   : > { %p850_p7 = pnand %p849_p5, %p843_p12 }
  0x34   : > { %853 = shalt.err (!%p850_p7)
}
  0x35   : > { %776 = dma.hbm_to_vmem [thread:$0]  (!%p1068_p13), %s1078_s5, 128, %s1080_s7, %s1083_s8  }
  0x36   : > { %p196_p9 = scmp.lt.s32.totalorder %s984_s15, 3  ;;  %s617_s6 = sshll.u32 %s984_s15, 4 }
  0x37   : > { %p1339_p0 = scmp.ge.s32.totalorder %s984_s15, 1  ;;  %s1341_s0 = sld [smem:[#allocation13_spill]] }
  0x38   : > { %s147_s20 = scalar_lea.vmem [#allocation2], %s1066_s25  ;;  %s145_s5 = scalar_lea.sflag [#allocation3], %s1066_s25 }
  0x39   : > { %p1117_p4 = pnand %p1339_p0, %p196_p9  ;;  %s154_s28 = sshll.u32 %s147_s20, 4  ;;  %s155_s28 = int_to_ptr.vmem [resolvable:$true] %s154_s28 }
  0x3b   : > { %s1340_s9 = scalar_select %p1117_p4, 1, 0 }
  0x3d   : > { %s1124_s19 = scalar_lea.hbm %s1341_s0, %s617_s6  ;;  %s859_s4 = scalar_lea.hbm %s1341_s0, 32 }
  0x3e   : > { %s854_s7 = scalar_lea.hbm %s1124_s19, 16  ;;  %p860_p8 = scmp.lt.u32.totalorder %s1124_s19, %s1341_s0 }
  0x3f   : > { %p855_p6 = scmp.ne.s32.totalorder %s1124_s19, %s854_s7  ;;  %p861_p10 = scmp.lt.u32.totalorder %s859_s4, %s854_s7 }
  0x40   : > { %p863_p3 = scmp.lt.u32.totalorder %s854_s7, %s1124_s19 }
  0x41   : > { %p857_p11 = pnand %p855_p6, %p1089_p2  ;;  %p862_p1 = por %p861_p10, %p860_p8 }
  0x43   : > { %p858_p12 = pneg %p857_p11  ;;  %p864_p5 = por %p863_p3, %p862_p1 }
  0x45   : > { %p865_p7 = pnand %p864_p5, %p858_p12 }
  0x47   : > { %868 = shalt.err (!%p865_p7)
}
  0x48   : > { %s869_s17 = scalar_lea.vmem %s155_s28, 16  ;;  %s987_s20 = smov [#allocation2]  }
  0x49   : > { %p870_p9 = scmp.ne.s32.totalorder %s155_s28, %s869_s17  ;;  %s874_s27 = sshll.u32 %s987_s20, 4  ;;  %s875_s27 = int_to_ptr.vmem [resolvable:$false] %s874_s27 }
  0x4a   : > { %s876_s29 = scalar_lea.vmem %s875_s27, 32  ;;  %p877_p11 = scmp.lt.s32.totalorder %s155_s28, %s875_s27 }
  0x4b   : > { %p872_p0 = pnand %p870_p9, %p1089_p2  ;;  %p878_p4 = scmp.lt.s32.totalorder %s876_s29, %s869_s17 }
  0x4d   : > { %p873_p6 = pneg %p872_p0  ;;  %p879_p13 = por %p878_p4, %p877_p11 }
  0x4f   : > { %p880_p8 = pnand %p879_p13, %p873_p6 }
  0x51   : > { %883 = shalt.err (!%p880_p8)
}
  0x52   : > { %p1342_p10 = scmp.ne.s32.totalorder %s1336_s26, 0  ;;  %s622_s7 = sshll.u32 %s984_s15, 6 }
  0x53   : > { %s1343_s30 = sshll.u32 %s1066_s25, 2  ;;  %s189_s0 = scalar_lea.hbm %s1324_s2, %s622_s7 }
  0x54   : > { %773 = dma.hbm_to_vmem [thread:$0]  (!%p1342_p10), %s1124_s19, 16, %s155_s28, %s145_s5  }
  0x55   : > { %s184_s4 = scalar_lea.vmem [#allocation7], %s1343_s30  ;;  %s884_s27 = scalar_lea.hbm %s189_s0, 64 }
  0x56   : > { %s191_s6 = sshll.u32 %s184_s4, 4  ;;  %p885_p4 = scmp.ne.s32.totalorder %s189_s0, %s884_s27  ;;  %s192_s6 = int_to_ptr.vmem [resolvable:$true] %s191_s6 }
  0x57   : > { %s889_s1 = scalar_lea.hbm %s1324_s2, 128  ;;  %p890_p1 = scmp.lt.u32.totalorder %s189_s0, %s1324_s2 }
  0x58   : > { %p887_p13 = pnand %p885_p4, %p1089_p2  ;;  %p891_p3 = scmp.lt.u32.totalorder %s889_s1, %s884_s27 }
  0x59   : > { %p893_p7 = scmp.lt.u32.totalorder %s884_s27, %s189_s0 }
  0x5a   : > { %p888_p12 = pneg %p887_p13  ;;  %p892_p5 = por %p891_p3, %p890_p1 }
  0x5c   : > { %p894_p9 = por %p893_p7, %p892_p5 }
  0x5e   : > { %p895_p0 = pnand %p894_p9, %p888_p12 }
  0x60   : > { %898 = shalt.err (!%p895_p0)
}
  0x61   : > { %s899_s25 = scalar_lea.vmem %s192_s6, 64  ;;  %s988_s28 = smov [#allocation7]  }
  0x62   : > { %p900_p6 = scmp.ne.s32.totalorder %s192_s6, %s899_s25  ;;  %s904_s5 = sshll.u32 %s988_s28, 4  ;;  %s905_s5 = int_to_ptr.vmem [resolvable:$false] %s904_s5 }
  0x63   : > { %s906_s7 = scalar_lea.vmem %s905_s5, 128  ;;  %p907_p4 = scmp.lt.s32.totalorder %s192_s6, %s905_s5 }
  0x64   : > { %p902_p11 = pnand %p900_p6, %p1089_p2  ;;  %p908_p13 = scmp.lt.s32.totalorder %s906_s7, %s899_s25 }
  0x66   : > { %p903_p8 = pneg %p902_p11  ;;  %p909_p10 = por %p908_p13, %p907_p4 }
  0x68   : > { %p910_p1 = pnand %p909_p10, %p903_p8 }
  0x6a   : > { %913 = shalt.err (!%p910_p1)
}
  0x6b   : > { %p1344_p3 = scmp.ne.s32.totalorder %s1336_s26, 0  ;;  %p1345_p12 = scmp.ne.s32.totalorder %s1340_s9, 0 }
  0x6c   : > { %s1168_s1 = sand.u32 (!%p1345_p12), 1, %s976_s13   ;;  %p1346_p2 = scmp.ne.s32.totalorder (!%p1345_p12), %s1333_s22, 0 }
  0x6d   : > { %779 = dma.hbm_to_vmem [thread:$0]  (!%p1344_p3), %s189_s0, 64, %s192_s6, %s1083_s8  }
  0x6e   : > { %200 = sbr.rel (%p1345_p12) target bundleno = 436 (0x1b4), region = 32  ;;  %s203_s21 = scalar_lea.sflag (!%p1345_p12), [#allocation3], %s1168_s1 }
  0x6f   : > { %s205_s10 = scalar_lea.vmem (!%p1345_p12), [#allocation2], %s1168_s1 }
  0x75   : > { %959 = dma.done.wait (%p1346_p2), %s203_s21, 16  }
  0x76   : > { %961 = vsyncadd (%p1346_p2), %s203_s21, 4294967280  ;;  %s210_s0 = sand.u32 1, %s1032_s16   ;;  %s624_s26 = sshll.u32 %s1168_s1, 3 }
  0x77   : > { %s211_s8 = scalar_lea.sflag [#allocation6], %s210_s0  ;;  %s1178_s9 = scalar_lea.vmem [#allocation5], %s624_s26 }
  0x78   : > { %963 = dma.done.wait (%p1346_p2), %s211_s8, 192  }
  0x79   : > { %965 = vsyncadd (%p1346_p2), %s211_s8, 4294967104  ;;  %v257_v0 = vlaneseq  ;;  %v1195_v11 = vld [vmem:[%s205_s10] ss:$0 sm:$0xff]  ;;  %v989_v14 = vmov 1.0|1.0   ;;  %v254_v21 = vld [vmem:[%s1178_s9] sm:$0xff] }
  0x7a   : > { %v391_v26 = vcombine.high %v254_v21, %v254_v21  ;;  %s625_s22 = sshll.u32 %s1168_s1, 2  ;;  %s691_s4 = sshll.u32 %s1032_s16, 4 }
  0x7b   : > { %v1184_v1 = vshrl.u32 %v257_v0, 7  ;;  %s223_s30 = scalar_lea.vmem [#allocation7], %s625_s22  ;;  %s253_s6 = scalar_lea.vmem [#allocation8], %s1168_s1 }
  0x7c   : > { %457 = vmatprep.mubr.f32.mxu0 %v391_v26  ;;  %v255_v37 = vld [vmem:[%s223_s30] sm:$0xf]  ;;  %s508_s11 = sshll.u32 %s253_s6, 4  ;;  %s1278_s17 = scalar_lea.hbm %s1325_s3, %s691_s4  ;;  %s1280_s11 = int_to_ptr.vmem [resolvable:$true] %s508_s11 }
  0x7d   : > { %v274_v2 = vadd.s32 128, %v1184_v1  ;;  %v275_v3 = vadd.s32 136, %v1184_v1  ;;  %v259_v4 = vadd.s32 8, %v1184_v1  ;;  %v276_v5 = vadd.s32 144, %v1184_v1  ;;  %s496_s29 = scalar_lea.sflag [#allocation4], %s1168_s1  ;;  %s914_s19 = scalar_lea.vmem %s1280_s11, 16 }
  0x7e   : > { %v277_v6 = vadd.s32 152, %v1184_v1  ;;  %v260_v7 = vadd.s32 16, %v1184_v1  ;;  %v261_v8 = vadd.s32 24, %v1184_v1  ;;  %v278_v9 = vadd.s32 160, %v1184_v1  ;;  %p915_p10 = scmp.ne.s32.totalorder %s1280_s11, %s914_s19  ;;  %p1347_p5 = scmp.ne.s32.totalorder %s1334_s23, 0 }
  0x7f   : > { %v279_v10 = vadd.s32 168, %v1184_v1  ;;  %v262_v12 = vadd.s32 32, %v1184_v1  ;;  %v263_v13 = vadd.s32 40, %v1184_v1  ;;  %vm310_vm0 = vcmp.eq.s32.totalorder %v274_v2, %v1195_v11  ;;  %s990_s16 = smov [#allocation8]  }
  0x80   : > { %vm311_vm1 = vcmp.eq.s32.totalorder %v275_v3, %v1195_v11  ;;  %vm294_vm2 = vcmp.eq.s32.totalorder %v1184_v1, %v1195_v11  ;;  %vm295_vm3 = vcmp.eq.s32.totalorder %v259_v4, %v1195_v11  ;;  %vm312_vm5 = vcmp.eq.s32.totalorder %v276_v5, %v1195_v11  ;;  %p916_p7 = pnand %p915_p10, %p1347_p5  ;;  %s918_s25 = sshll.u32 %s990_s16, 4  ;;  %s919_s25 = int_to_ptr.vmem [resolvable:$false] %s918_s25 }
  0x81   : > { %vm730_vm4 = vmpackc.low %vm311_vm1, %vm310_vm0  ;;  %vm313_vm6 = vcmp.eq.s32.totalorder %v277_v6, %v1195_v11  ;;  %vm296_vm7 = vcmp.eq.s32.totalorder %v260_v7, %v1195_v11  ;;  %vm297_vm8 = vcmp.eq.s32.totalorder %v261_v8, %v1195_v11  ;;  %vm314_vm10 = vcmp.eq.s32.totalorder %v278_v9, %v1195_v11  ;;  %s920_s28 = scalar_lea.vmem %s919_s25, 32  ;;  %p921_p0 = scmp.lt.s32.totalorder %s1280_s11, %s919_s25 }
  0x82   : > { %731 = vmatprep.subr.msk.bf16.mxu0 %vm730_vm4, %v989_v14  ;;  %vm732_vm9 = vmpackc.low %vm295_vm3, %vm294_vm2  ;;  %vm315_vm11 = vcmp.eq.s32.totalorder %v279_v10, %v1195_v11  ;;  %v280_v15 = vadd.s32 176, %v1184_v1  ;;  %v281_v16 = vadd.s32 184, %v1184_v1  ;;  %v264_v17 = vadd.s32 48, %v1184_v1  ;;  %p917_p9 = pneg %p916_p7  ;;  %p922_p6 = scmp.lt.s32.totalorder %s920_s28, %s914_s19 }
  0x83   : > { %733 = vmatpush3.bf16.msk.msra.mxu0 %vm732_vm9, %v989_v14  ;;  %vm734_vm12 = vmpackc.low %vm313_vm6, %vm312_vm5  ;;  %vm298_vm15 = vcmp.eq.s32.totalorder %v262_v12, %v1195_v11  ;;  %vm299_vm0 = vcmp.eq.s32.totalorder %v263_v13, %v1195_v11  ;;  %v265_v18 = vadd.s32 56, %v1184_v1  ;;  %v282_v19 = vadd.s32 192, %v1184_v1 }
  0x84   : > { %735 = vmatprep.subr.msk.bf16.mxu0 %vm734_vm12, %v989_v14  ;;  %vm736_vm13 = vmpackc.low %vm297_vm8, %vm296_vm7  ;;  %vm316_vm1 = vcmp.eq.s32.totalorder %v280_v15, %v1195_v11  ;;  %vm317_vm2 = vcmp.eq.s32.totalorder %v281_v16, %v1195_v11  ;;  %v283_v20 = vadd.s32 200, %v1184_v1  ;;  %vm300_vm4 = vcmp.eq.s32.totalorder %v264_v17, %v1195_v11  ;;  %p923_p11 = por %p922_p6, %p921_p0 }
  0x85   : > { %vm738_vm14 = vmpackc.low %vm315_vm11, %vm314_vm10  ;;  %vm301_vm6 = vcmp.eq.s32.totalorder %v265_v18, %v1195_v11  ;;  %vm318_vm7 = vcmp.eq.s32.totalorder %v282_v19, %v1195_v11  ;;  %v266_v22 = vadd.s32 64, %v1184_v1  ;;  %v267_v23 = vadd.s32 72, %v1184_v1 }
  0x86   : > { %vm740_vm3 = vmpackc.low %vm299_vm0, %vm298_vm15  ;;  %vm319_vm8 = vcmp.eq.s32.totalorder %v283_v20, %v1195_v11  ;;  %v284_v24 = vadd.s32 208, %v1184_v1  ;;  %v285_v25 = vadd.s32 216, %v1184_v1  ;;  %v268_v27 = vadd.s32 80, %v1184_v1  ;;  %p924_p8 = pnand %p923_p11, %p917_p9 }
  0x87   : > { %737 = vmatpush3.bf16.msk.msra.mxu0 %vm736_vm13, %v989_v14  ;;  %vm742_vm5 = vmpackc.low %vm317_vm2, %vm316_vm1  ;;  %vm302_vm11 = vcmp.eq.s32.totalorder %v266_v22, %v1195_v11  ;;  %vm303_vm12 = vcmp.eq.s32.totalorder %v267_v23, %v1195_v11  ;;  %v269_v28 = vadd.s32 88, %v1184_v1  ;;  %v286_v29 = vadd.s32 224, %v1184_v1 }
  0x88   : > { %739 = vmatprep.subr.msk.bf16.mxu0 %vm738_vm14, %v989_v14  ;;  %vm744_vm9 = vmpackc.low %vm301_vm6, %vm300_vm4  ;;  %vm320_vm13 = vcmp.eq.s32.totalorder %v284_v24, %v1195_v11  ;;  %vm321_vm14 = vcmp.eq.s32.totalorder %v285_v25, %v1195_v11  ;;  %v287_v30 = vadd.s32 232, %v1184_v1  ;;  %vm304_vm1 = vcmp.eq.s32.totalorder %v268_v27, %v1195_v11 }
  0x89   : > { %vm746_vm10 = vmpackc.low %vm319_vm8, %vm318_vm7  ;;  %vm305_vm2 = vcmp.eq.s32.totalorder %v269_v28, %v1195_v11  ;;  %v270_v31 = vadd.s32 96, %v1184_v1  ;;  %v271_v32 = vadd.s32 104, %v1184_v1  ;;  %v288_v33 = vadd.s32 240, %v1184_v1 }
  0x8a   : > { %vm748_vm15 = vmpackc.low %vm303_vm12, %vm302_vm11  ;;  %vm323_vm4 = vcmp.eq.s32.totalorder %v287_v30, %v1195_v11  ;;  %v289_v34 = vadd.s32 248, %v1184_v1  ;;  %v272_v35 = vadd.s32 112, %v1184_v1  ;;  %v273_v36 = vadd.s32 120, %v1184_v1 }
  0x8b   : > { %741 = vmatpush3.bf16.msk.msra.mxu0 %vm740_vm3, %v989_v14  ;;  %vm750_vm0 = vmpackc.low %vm321_vm14, %vm320_vm13  ;;  %vm322_vm3 = vcmp.eq.s32.totalorder %v286_v29, %v1195_v11  ;;  %vm306_vm7 = vcmp.eq.s32.totalorder %v270_v31, %v1195_v11  ;;  %vm307_vm8 = vcmp.eq.s32.totalorder %v271_v32, %v1195_v11  ;;  %v475_v38 = vmul.f32 %v255_v37, %v255_v37 }
  0x8c   : > { %743 = vmatprep.subr.msk.bf16.mxu0 %vm742_vm5, %v989_v14  ;;  %vm752_vm5 = vmpackc.low %vm305_vm2, %vm304_vm1  ;;  %vm308_vm13 = vcmp.eq.s32.totalorder %v272_v35, %v1195_v11  ;;  %vm309_vm14 = vcmp.eq.s32.totalorder %v273_v36, %v1195_v11 }
  0x8d   : > { %vm754_vm6 = vmpackc.low %vm323_vm4, %vm322_vm3 }
  0x8e   : > { %vm756_vm11 = vmpackc.low %vm307_vm8, %vm306_vm7 }
  0x8f   : > { %745 = vmatpush3.bf16.msk.msra.mxu0 %vm744_vm9, %v989_v14  ;;  %vm324_vm9 = vcmp.eq.s32.totalorder %v288_v33, %v1195_v11 }
  0x90   : > { %747 = vmatprep.subr.msk.bf16.mxu0 %vm746_vm10, %v989_v14  ;;  %vm325_vm10 = vcmp.eq.s32.totalorder %v289_v34, %v1195_v11 }
  0x91   : > { %vm758_vm12 = vmpackc.low %vm325_vm10, %vm324_vm9 }
  0x93   : > { %749 = vmatpush3.bf16.msk.msra.mxu0 %vm748_vm15, %v989_v14  ;;  %vm760_vm15 = vmpackc.low %vm309_vm14, %vm308_vm13 }
  0x94   : > { %751 = vmatprep.subr.msk.bf16.mxu0 %vm750_vm0, %v989_v14  ;;  %vm464_vm0 = vcmask 1043456  }
  0x95   : > { %v476_v39 = vsel %vm464_vm0, %v475_v38, 0.0 }
  0x96   : > { %v477_v40 = vrot.slane %v476_v39, 4 }
  0x97   : > { %753 = vmatpush3.bf16.msk.msra.mxu0 %vm752_vm5, %v989_v14 }
  0x98   : > { %755 = vmatprep.subr.msk.bf16.mxu0 %vm754_vm6, %v989_v14  ;;  %v478_v41 = vadd.f32 %v477_v40, %v476_v39 }
  0x9a   : > { %v479_v42 = vrot.slane %v478_v41, 2 }
  0x9b   : > { %757 = vmatpush3.bf16.msk.msra.mxu0 %vm756_vm11, %v989_v14 }
  0x9c   : > { %759 = vmatprep.subr.msk.bf16.mxu0 %vm758_vm12, %v989_v14  ;;  %v480_v45 = vadd.f32 %v479_v42, %v478_v41 }
  0x9e   : > { %v481_v48 = vrot.slane %v480_v45, 1 }
  0x9f   : > { %761 = vmatpush3.bf16.msk.msra.mxu0 %vm760_vm15, %v989_v14 }
  0xa0   : > { %v482_v52 = vadd.f32 %v481_v48, %v480_v45 }
  0xa2   : > { %458 = vmatmul.mubr.f32.vlgmr.msra.gmra.mrb[0].mxu0 %v254_v21  ;;  %v483_v55 = vmax.f32 %v482_v52, 1e-24 }
  0xa4   : > { %820 = vrsqrt.f32 %v483_v55 }
  0xae   : > { %v821_v59 = vpop.eup %820 }
  0xaf   : > { %v485_v60 = vmul.f32 %v821_v59, %v255_v37 }
 0x175   : > { %v727_v43 = vpop.f32.mrb[0].mxu0 }
 0x176   : > { %v728_v44 = vpop.f32.mrb[1].mxu0 }
 0x177   : > { %v729_v46 = vadd.f32 %v728_v44, %v727_v43 }
 0x179   : > { %v463_v47 = vmul.f32 %v729_v46, %v729_v46 }
 0x17b   : > { %v465_v49 = vsel %vm464_vm0, %v463_v47, 0.0 }
 0x17c   : > { %v466_v50 = vrot.slane %v465_v49, 4 }
 0x17e   : > { %v467_v51 = vadd.f32 %v466_v50, %v465_v49 }
 0x180   : > { %v468_v53 = vrot.slane %v467_v51, 2 }
 0x182   : > { %v469_v54 = vadd.f32 %v468_v53, %v467_v51 }
 0x184   : > { %v470_v56 = vrot.slane %v469_v54, 1 }
 0x186   : > { %v471_v57 = vadd.f32 %v470_v56, %v469_v54 }
 0x188   : > { %v472_v58 = vmax.f32 %v471_v57, 1e-24 }
 0x18a   : > { %822 = vrsqrt.f32 %v472_v58 }
 0x194   : > { %v823_v61 = vpop.eup %822 }
 0x195   : > { %v474_v62 = vmul.f32 %v823_v61, %v729_v46 }
 0x197   : > { %v486_v63 = vmul.f32 %v485_v60, %v474_v62 }
 0x199   : > { %v487_v0 = vsel %vm464_vm0, %v486_v63, 0.0 }
 0x19a   : > { %v488_v1 = vrot.slane %v487_v0, 4 }
 0x19c   : > { %v489_v2 = vadd.f32 %v488_v1, %v487_v0 }
 0x19e   : > { %v490_v3 = vrot.slane %v489_v2, 2 }
 0x1a0   : > { %v491_v4 = vadd.f32 %v490_v3, %v489_v2 }
 0x1a2   : > { %v492_v5 = vrot.slane %v491_v4, 1 }
 0x1a4   : > { %v493_v6 = vadd.f32 %v492_v5, %v491_v4 }
 0x1a6   : > { %494 = vst [vmem:[%s253_s6] sm:$0x1] %v493_v6 }
 0x1a7   : > { %927 = shalt.err (!%p924_p8)
}
 0x1a8   : > { %s928_s5 = scalar_lea.hbm %s1278_s17, 16  ;;  %s932_s21 = scalar_lea.hbm %s1325_s3, 32 }
 0x1a9   : > { %p929_p4 = scmp.ne.s32.totalorder %s1278_s17, %s928_s5  ;;  %p933_p3 = scmp.lt.u32.totalorder %s1278_s17, %s1325_s3 }
 0x1aa   : > { %p934_p12 = scmp.lt.u32.totalorder %s932_s21, %s928_s5  ;;  %p936_p10 = scmp.lt.u32.totalorder %s928_s5, %s1278_s17 }
 0x1ab   : > { %p930_p13 = pnand %p929_p4, %p1347_p5 }
 0x1ac   : > { %p935_p2 = por %p934_p12, %p933_p3 }
 0x1ad   : > { %p931_p1 = pneg %p930_p13 }
 0x1ae   : > { %p937_p7 = por %p936_p10, %p935_p2 }
 0x1b0   : > { %p938_p9 = pnand %p937_p7, %p931_p1 }
 0x1b2   : > { %941 = shalt.err (!%p938_p9)
}
 0x1b3   : > { %768 = dma.vmem_to_hbm [thread:$0]  (%p1347_p5), %s1280_s11, 16, %s1278_s17, %s496_s29  }
 0x1b4 PF: > { %s520_s26 = sand.u32 1, %s972_s12   ;;  %p1348_p0 = scmp.ne.s32.totalorder %s1335_s24, 0 }
 0x1b5   : > { %p1349_p6 = scmp.ge.s32.totalorder %s984_s15, 2  ;;  %s521_s8 = scalar_lea.sflag [#allocation4], %s520_s26 }
 0x1b7   : > { %p781_p11 = pnand %p1349_p6, %p1348_p0 }
 0x1b9   : > { %967 = dma.done.wait (!%p781_p11), %s521_s8, 16  }
 0x1ba   : > { %969 = vsyncadd (!%p781_p11), %s521_s8, 4294967280  ;;  %s1350_s9 = sld [smem:[#allocation12_spill]]  ;;  %p19_p8 = scmp.ge.s32.totalorder %s1036_s18, 4  }
 0x1bb   : > { %s1351_s12 = smov %s976_s13  ;;  %s1352_s13 = smov %s980_s14 }
 0x1bc   : > { %s1354_s15 = smov %s1036_s18  ;;  %21 = sbr.rel (!%p19_p8) target bundleno = 10 (0xa), region = 101 }
 0x1c0   : > { %s1353_s14 = smov %s1350_s9 }
 0x1c3   :  { %525 = vsyncpa [#allocation3], 1 }
 0x1c4   :  { %527 = vsyncpa [#allocation3 + $0x1], 1 }
 0x1c5   :  { %528 = vsyncpa [#allocation6], 1 }
 0x1c6   :  { %530 = vsyncpa [#allocation6 + $0x1], 1 }
 0x1c7   :  { %531 = vsyncpa [#allocation4], 1 }
 0x1c8   :  { %533 = vsyncpa [#allocation4 + $0x1], 1 }

</bundles_post_ra>
